<compile_context>
chip_gen: v7x
topology: tpu7x:2x2x1
jax: 0.10.0
libtpu: 0.0.40
codegen_flags: <defaults>
</compile_context>

<pallas_src>
import functools

import jax
import jax.numpy as jnp
from jax.experimental import pallas as pl
from jax.experimental.pallas import tpu as pltpu


# Synthetic derived architecture: 2 nodes, each summing 2 ReLU-Conv1x1-BN ops, stride=1.
DERIVED_ARCHITECTURE = [
    [(0, "relu_conv1x1_bn"), (1, "relu_conv1x1_bn")],   # node 2: f(states[0]) + f(states[1])
    [(0, "relu_conv1x1_bn"), (2, "relu_conv1x1_bn")],   # node 3: f(states[0]) + f(states[2])
]
NUM_NODES = len(DERIVED_ARCHITECTURE)

P_TILE = 128                      # lane-tile width (multiple of 128 -> unmasked vst)


# ------------------------------------------------------------------- kernel --

def cell_kernel(s0_ref, s1_ref, w_pre_ref, b_pre_ref, w_node_ref, b_node_ref, o_ref):
    """Fused cell on one (C, P_TILE) lane tile.

    s0_ref, s1_ref : (C, PT)            bf16 activations
    w_pre_ref      : (2, C, C)          bf16 folded preprocess weights
    b_pre_ref      : (2, C, 1)          f32  folded preprocess biases
    w_node_ref     : (NUM_NODES, C, 2C) bf16 per-node concatenated weights
    b_node_ref     : (NUM_NODES, C, 1)  f32  per-node summed biases
    o_ref          : (NUM_NODES*C, PT)  f32  channel-concatenated node outputs
    """
    # preprocess0 / preprocess1:  W' @ relu(x) + b   (bf16 MXU, f32 accumulate)
    def pre(x_ref, k):
        x = jnp.maximum(x_ref[...], 0).astype(jnp.bfloat16)
        y = jnp.dot(w_pre_ref[k], x, preferred_element_type=jnp.float32)
        return y + b_pre_ref[k]

    states = [pre(s0_ref, 0), pre(s1_ref, 1)]

    node_outs = []
    for k, node_ops in enumerate(DERIVED_ARCHITECTURE):
        (ia, _), (ib, _) = node_ops
        xa = jnp.maximum(states[ia], 0.0).astype(jnp.bfloat16)
        xb = jnp.maximum(states[ib], 0.0).astype(jnp.bfloat16)
        x_cat = jnp.concatenate([xa, xb], axis=0)                    # (2C, PT)
        y = jnp.dot(w_node_ref[k], x_cat,
                    preferred_element_type=jnp.float32) + b_node_ref[k]
        states.append(y)
        node_outs.append(y)

    # one lane-dense store of the concatenated node outputs
    o_ref[...] = jnp.concatenate(node_outs, axis=0)


# --------------------------------------------------------------- parameters --

def init_op_params(key, C):
    """One ReLU-Conv1x1(bias=False)-BN op with BN folded into (W', b)."""
    k1, k2, k3 = jax.random.split(key, 3)
    w = jax.random.normal(k1, (C, C), jnp.float32) / jnp.sqrt(jnp.float32(C))
    gamma = 1.0 + 0.1 * jax.random.normal(k2, (C,), jnp.float32)
    beta = 0.1 * jax.random.normal(k3, (C,), jnp.float32)
    running_mean = jnp.zeros((C,), jnp.float32)
    running_var = jnp.ones((C,), jnp.float32)
    eps = 1e-5
    s = gamma / jnp.sqrt(running_var + eps)      # per-output-channel scale
    b = beta - running_mean * s
    w_folded = w * s[:, None]                    # exact: scale acts on output rows
    return w_folded, b.reshape(C, 1)


def init_cell_params(key, C):
    keys = jax.random.split(key, 2 + 2 * NUM_NODES)
    w0, b0 = init_op_params(keys[0], C)
    w1, b1 = init_op_params(keys[1], C)
    w_pre = jnp.stack([w0, w1]).astype(jnp.bfloat16)        # (2, C, C)
    b_pre = jnp.stack([b0, b1])                             # (2, C, 1) f32

    w_nodes, b_nodes = [], []
    ki = 2
    for _node_ops in DERIVED_ARCHITECTURE:
        wa, ba = init_op_params(keys[ki], C); ki += 1
        wb, bb = init_op_params(keys[ki], C); ki += 1
        w_nodes.append(jnp.concatenate([wa, wb], axis=1))   # (C, 2C)  [Wa' Wb']
        b_nodes.append(ba + bb)                             # (C, 1)
    w_node = jnp.stack(w_nodes).astype(jnp.bfloat16)        # (NUM_NODES, C, 2C)
    b_node = jnp.stack(b_nodes)                             # (NUM_NODES, C, 1) f32
    return {"w_pre": w_pre, "b_pre": b_pre, "w_node": w_node, "b_node": b_node}


# ------------------------------------------------------------- layout glue  --

def nchw_to_cp(x):
    N, C, H, W = x.shape
    return jnp.transpose(x, (1, 0, 2, 3)).reshape(C, N * H * W)


def cp_to_nchw(xm, N, H, W):
    C = xm.shape[0]
    return jnp.transpose(xm.reshape(C, N, H, W), (1, 0, 2, 3))


# ------------------------------------------------------------- cell forward --

def cell_forward(s0, s1, params, p_tile=P_TILE):
    N, C, H, W = s0.shape
    P = N * H * W

    # single entry transpose, stream activations as bf16
    s0m = nchw_to_cp(s0).astype(jnp.bfloat16)
    s1m = nchw_to_cp(s1).astype(jnp.bfloat16)

    p_pad = pl.cdiv(P, p_tile) * p_tile
    if p_pad != P:
        pad = ((0, 0), (0, p_pad - P))
        s0m = jnp.pad(s0m, pad)
        s1m = jnp.pad(s1m, pad)

    grid = (p_pad // p_tile,)
    out = pl.pallas_call(
        cell_kernel,
        out_shape=jax.ShapeDtypeStruct((NUM_NODES * C, p_pad), jnp.float32),
        grid_spec=pltpu.PrefetchScalarGridSpec(
            num_scalar_prefetch=0,
            grid=grid,
            in_specs=[
                pl.BlockSpec((C, p_tile), lambda i: (0, i)),          # s0 tile
                pl.BlockSpec((C, p_tile), lambda i: (0, i)),          # s1 tile
                pl.BlockSpec((2, C, C), lambda i: (0, 0, 0)),         # pre weights (resident)
                pl.BlockSpec((2, C, 1), lambda i: (0, 0, 0)),         # pre biases  (resident)
                pl.BlockSpec((NUM_NODES, C, 2 * C), lambda i: (0, 0, 0)),  # node weights
                pl.BlockSpec((NUM_NODES, C, 1), lambda i: (0, 0, 0)),      # node biases
            ],
            out_specs=pl.BlockSpec((NUM_NODES * C, p_tile), lambda i: (0, i)),
        ),
        compiler_params=pltpu.CompilerParams(
            dimension_semantics=("parallel",),        # lets v7x split tiles across its 2 TCs
            vmem_limit_bytes=32 * 1024 * 1024,        # safe on v5e/v6e/v7x at this tile size
        ),
    )(s0m, s1m, params["w_pre"], params["b_pre"], params["w_node"], params["b_node"])

    out = out[:, :P]
    # single exit transpose; channel concat of node outputs is already done in-kernel
    return cp_to_nchw(out, N, H, W)


# --------------------------------------------------------------------- main --

if __name__ == "__main__":
    key = jax.random.PRNGKey(0)
    kx0, kx1, kp = jax.random.split(key, 3)

    N, C, H, W = 2, 16, 16, 16          # P = N*H*W = 512 -> 4 lane tiles of 128
    s0 = jax.random.normal(kx0, (N, C, H, W), jnp.float32)
    s1 = jax.random.normal(kx1, (N, C, H, W), jnp.float32)
    params = init_cell_params(kp, C)

    fwd = jax.jit(functools.partial(cell_forward, params=params))
    out = jax.block_until_ready(fwd(s0, s1))

    expected_channels = C * NUM_NODES
    assert out.shape == (N, expected_channels, H, W), out.shape
    assert bool(jnp.isfinite(out).all())
    print("KERNEL_OK")
</pallas_src>

<mosaic_0001>
module attributes {stable_mosaic.version = 11 : i64} {
  func.func @cell_kernel(%arg0: i32, %arg1: memref<16x128xbf16, #tpu.memory_space<vmem>>, %arg2: memref<16x128xbf16, #tpu.memory_space<vmem>>, %arg3: memref<2x16x16xbf16, #tpu.memory_space<vmem>>, %arg4: memref<2x16x1xf32, #tpu.memory_space<vmem>>, %arg5: memref<2x16x32xbf16, #tpu.memory_space<vmem>>, %arg6: memref<2x16x1xf32, #tpu.memory_space<vmem>>, %arg7: memref<32x128xf32, #tpu.memory_space<vmem>>) attributes {dimension_semantics = [#tpu.dimension_semantics<parallel>], iteration_bounds = array<i64: 4>, scalar_prefetch = 0 : i64, scratch_operands = 0 : i64, tpu.core_type = #tpu.core_type<tc>, window_params = [{transform_indices = @transform_0, window_bounds = array<i64: 16, 128>}, {transform_indices = @transform_1, window_bounds = array<i64: 16, 128>}, {pipeline_mode = #tpu.pipeline_mode<synchronous>, transform_indices = @transform_2, window_bounds = array<i64: 2, 16, 16>}, {pipeline_mode = #tpu.pipeline_mode<synchronous>, transform_indices = @transform_3, window_bounds = array<i64: 2, 16, 1>}, {pipeline_mode = #tpu.pipeline_mode<synchronous>, transform_indices = @transform_4, window_bounds = array<i64: 2, 16, 32>}, {pipeline_mode = #tpu.pipeline_mode<synchronous>, transform_indices = @transform_5, window_bounds = array<i64: 2, 16, 1>}, {transform_indices = @transform_6, window_bounds = array<i64: 32, 128>}]} {
    %c0 = arith.constant 0 : index
    %c0_0 = arith.constant 0 : index
    %0 = vector.load %arg1[%c0, %c0_0] : memref<16x128xbf16, #tpu.memory_space<vmem>>, vector<16x128xbf16>
    %cst = arith.constant 0.000000e+00 : bf16
    %1 = vector.broadcast %cst : bf16 to vector<16x128xbf16>
    %2 = arith.maximumf %0, %1 : vector<16x128xbf16>
    %c0_1 = arith.constant 0 : index
    %c0_2 = arith.constant 0 : index
    %c0_3 = arith.constant 0 : index
    %3 = vector.load %arg3[%c0_1, %c0_2, %c0_3] : memref<2x16x16xbf16, #tpu.memory_space<vmem>>, vector<1x16x16xbf16>
    %4 = vector.shape_cast %3 : vector<1x16x16xbf16> to vector<16x16xbf16>
    %cst_4 = arith.constant dense<0.000000e+00> : vector<16x128xf32>
    %5 = tpu.matmul %4, %2, %cst_4 {dimension_numbers = #tpu.dot_dimension_numbers<[1], [0], [0], [1], [0, 0, 1, 1], [], []>} : vector<16x16xbf16>, vector<16x128xbf16>, vector<16x128xf32> -> vector<16x128xf32>
    %c0_5 = arith.constant 0 : index
    %c0_6 = arith.constant 0 : index
    %c0_7 = arith.constant 0 : index
    %6 = vector.load %arg4[%c0_5, %c0_6, %c0_7] : memref<2x16x1xf32, #tpu.memory_space<vmem>>, vector<1x16x1xf32>
    %7 = vector.shape_cast %6 : vector<1x16x1xf32> to vector<16x1xf32>
    %8 = vector.broadcast %7 : vector<16x1xf32> to vector<16x128xf32>
    %9 = arith.addf %5, %8 : vector<16x128xf32>
    %c0_8 = arith.constant 0 : index
    %c0_9 = arith.constant 0 : index
    %10 = vector.load %arg2[%c0_8, %c0_9] : memref<16x128xbf16, #tpu.memory_space<vmem>>, vector<16x128xbf16>
    %cst_10 = arith.constant 0.000000e+00 : bf16
    %11 = vector.broadcast %cst_10 : bf16 to vector<16x128xbf16>
    %12 = arith.maximumf %10, %11 : vector<16x128xbf16>
    %c1 = arith.constant 1 : index
    %c0_11 = arith.constant 0 : index
    %c0_12 = arith.constant 0 : index
    %13 = vector.load %arg3[%c1, %c0_11, %c0_12] : memref<2x16x16xbf16, #tpu.memory_space<vmem>>, vector<1x16x16xbf16>
    %14 = vector.shape_cast %13 : vector<1x16x16xbf16> to vector<16x16xbf16>
    %cst_13 = arith.constant dense<0.000000e+00> : vector<16x128xf32>
    %15 = tpu.matmul %14, %12, %cst_13 {dimension_numbers = #tpu.dot_dimension_numbers<[1], [0], [0], [1], [0, 0, 1, 1], [], []>} : vector<16x16xbf16>, vector<16x128xbf16>, vector<16x128xf32> -> vector<16x128xf32>
    %c1_14 = arith.constant 1 : index
    %c0_15 = arith.constant 0 : index
    %c0_16 = arith.constant 0 : index
    %16 = vector.load %arg4[%c1_14, %c0_15, %c0_16] : memref<2x16x1xf32, #tpu.memory_space<vmem>>, vector<1x16x1xf32>
    %17 = vector.shape_cast %16 : vector<1x16x1xf32> to vector<16x1xf32>
    %18 = vector.broadcast %17 : vector<16x1xf32> to vector<16x128xf32>
    %19 = arith.addf %15, %18 : vector<16x128xf32>
    %cst_17 = arith.constant 0.000000e+00 : f32
    %20 = vector.broadcast %cst_17 : f32 to vector<16x128xf32>
    %21 = arith.maximumf %9, %20 : vector<16x128xf32>
    %22 = arith.truncf %21 : vector<16x128xf32> to vector<16x128xbf16>
    %cst_18 = arith.constant 0.000000e+00 : f32
    %23 = vector.broadcast %cst_18 : f32 to vector<16x128xf32>
    %24 = arith.maximumf %19, %23 : vector<16x128xf32>
    %25 = arith.truncf %24 : vector<16x128xf32> to vector<16x128xbf16>
    %26 = tpu.concatenate %22, %25 in 0 : vector<16x128xbf16>, vector<16x128xbf16> -> vector<32x128xbf16>
    %c0_19 = arith.constant 0 : index
    %c0_20 = arith.constant 0 : index
    %c0_21 = arith.constant 0 : index
    %27 = vector.load %arg5[%c0_19, %c0_20, %c0_21] : memref<2x16x32xbf16, #tpu.memory_space<vmem>>, vector<1x16x32xbf16>
    %28 = vector.shape_cast %27 : vector<1x16x32xbf16> to vector<16x32xbf16>
    %cst_22 = arith.constant dense<0.000000e+00> : vector<16x128xf32>
    %29 = tpu.matmul %28, %26, %cst_22 {dimension_numbers = #tpu.dot_dimension_numbers<[1], [0], [0], [1], [0, 0, 1, 1], [], []>} : vector<16x32xbf16>, vector<32x128xbf16>, vector<16x128xf32> -> vector<16x128xf32>
    %c0_23 = arith.constant 0 : index
    %c0_24 = arith.constant 0 : index
    %c0_25 = arith.constant 0 : index
    %30 = vector.load %arg6[%c0_23, %c0_24, %c0_25] : memref<2x16x1xf32, #tpu.memory_space<vmem>>, vector<1x16x1xf32>
    %31 = vector.shape_cast %30 : vector<1x16x1xf32> to vector<16x1xf32>
    %32 = vector.broadcast %31 : vector<16x1xf32> to vector<16x128xf32>
    %33 = arith.addf %29, %32 : vector<16x128xf32>
    %cst_26 = arith.constant 0.000000e+00 : f32
    %34 = vector.broadcast %cst_26 : f32 to vector<16x128xf32>
    %35 = arith.maximumf %9, %34 : vector<16x128xf32>
    %36 = arith.truncf %35 : vector<16x128xf32> to vector<16x128xbf16>
    %cst_27 = arith.constant 0.000000e+00 : f32
    %37 = vector.broadcast %cst_27 : f32 to vector<16x128xf32>
    %38 = arith.maximumf %33, %37 : vector<16x128xf32>
    %39 = arith.truncf %38 : vector<16x128xf32> to vector<16x128xbf16>
    %40 = tpu.concatenate %36, %39 in 0 : vector<16x128xbf16>, vector<16x128xbf16> -> vector<32x128xbf16>
    %c1_28 = arith.constant 1 : index
    %c0_29 = arith.constant 0 : index
    %c0_30 = arith.constant 0 : index
    %41 = vector.load %arg5[%c1_28, %c0_29, %c0_30] : memref<2x16x32xbf16, #tpu.memory_space<vmem>>, vector<1x16x32xbf16>
    %42 = vector.shape_cast %41 : vector<1x16x32xbf16> to vector<16x32xbf16>
    %cst_31 = arith.constant dense<0.000000e+00> : vector<16x128xf32>
    %43 = tpu.matmul %42, %40, %cst_31 {dimension_numbers = #tpu.dot_dimension_numbers<[1], [0], [0], [1], [0, 0, 1, 1], [], []>} : vector<16x32xbf16>, vector<32x128xbf16>, vector<16x128xf32> -> vector<16x128xf32>
    %c1_32 = arith.constant 1 : index
    %c0_33 = arith.constant 0 : index
    %c0_34 = arith.constant 0 : index
    %44 = vector.load %arg6[%c1_32, %c0_33, %c0_34] : memref<2x16x1xf32, #tpu.memory_space<vmem>>, vector<1x16x1xf32>
    %45 = vector.shape_cast %44 : vector<1x16x1xf32> to vector<16x1xf32>
    %46 = vector.broadcast %45 : vector<16x1xf32> to vector<16x128xf32>
    %47 = arith.addf %43, %46 : vector<16x128xf32>
    %48 = tpu.concatenate %33, %47 in 0 : vector<16x128xf32>, vector<16x128xf32> -> vector<32x128xf32>
    %c0_35 = arith.constant 0 : index
    %c0_36 = arith.constant 0 : index
    %49 = vector.load %arg7[%c0_35, %c0_36] : memref<32x128xf32, #tpu.memory_space<vmem>>, vector<32x128xf32>
    tpu.vector_store %arg7[%c0_35, %c0_36], %48 {strides = array<i32>} : memref<32x128xf32, #tpu.memory_space<vmem>>, vector<32x128xf32>,
    return
  }
  func.func @transform_0(%arg0: i32) -> (i32, i32) {
    %c0_i32 = arith.constant 0 : i32
    %c0_i32_0 = arith.constant 0 : i32
    return %c0_i32, %arg0 : i32, i32
  }
  func.func @transform_1(%arg0: i32) -> (i32, i32) {
    %c0_i32 = arith.constant 0 : i32
    %c0_i32_0 = arith.constant 0 : i32
    return %c0_i32, %arg0 : i32, i32
  }
  func.func @transform_2(%arg0: i32) -> (i32, i32, i32) {
    %c0_i32 = arith.constant 0 : i32
    %c0_i32_0 = arith.constant 0 : i32
    %c0_i32_1 = arith.constant 0 : i32
    %c0_i32_2 = arith.constant 0 : i32
    return %c0_i32, %c0_i32_0, %c0_i32_1 : i32, i32, i32
  }
  func.func @transform_3(%arg0: i32) -> (i32, i32, i32) {
    %c0_i32 = arith.constant 0 : i32
    %c0_i32_0 = arith.constant 0 : i32
    %c0_i32_1 = arith.constant 0 : i32
    %c0_i32_2 = arith.constant 0 : i32
    return %c0_i32, %c0_i32_0, %c0_i32_1 : i32, i32, i32
  }
  func.func @transform_4(%arg0: i32) -> (i32, i32, i32) {
    %c0_i32 = arith.constant 0 : i32
    %c0_i32_0 = arith.constant 0 : i32
    %c0_i32_1 = arith.constant 0 : i32
    %c0_i32_2 = arith.constant 0 : i32
    return %c0_i32, %c0_i32_0, %c0_i32_1 : i32, i32, i32
  }
  func.func @transform_5(%arg0: i32) -> (i32, i32, i32) {
    %c0_i32 = arith.constant 0 : i32
    %c0_i32_0 = arith.constant 0 : i32
    %c0_i32_1 = arith.constant 0 : i32
    %c0_i32_2 = arith.constant 0 : i32
    return %c0_i32, %c0_i32_0, %c0_i32_1 : i32, i32, i32
  }
  func.func @transform_6(%arg0: i32) -> (i32, i32) {
    %c0_i32 = arith.constant 0 : i32
    %c0_i32_0 = arith.constant 0 : i32
    return %c0_i32, %arg0 : i32, i32
  }
}

</mosaic_0001>

<bundles_post_ra>
// kernel: cell_forward.1
= control target key start
LH: loop header
LB: loop body
LE: loop exit
PB: predicated region body
PF: predicated region fallthrough
CT: control target
= control target key end

     0   :  { %s942_s21 = smov 0   ;;  %s944_s22 = smov 0   ;;  %s1071_s0 = inlined_call_operand.vmem [shape: bf16[16,512], index: 0, kind: input, shape index: {}]   ;;  %s1072_s1 = inlined_call_operand.vmem [shape: bf16[16,512], index: 1, kind: input, shape index: {}]   ;;  %s1073_s2 = inlined_call_operand.vmem [shape: bf16[2,16,16], index: 2, kind: input, shape index: {}]   ;;  %s1074_s3 = inlined_call_operand.vmem [shape: f32[2,16,1], index: 3, kind: input, shape index: {}]   ;;  %s1075_s4 = inlined_call_operand.vmem [shape: bf16[2,16,32], index: 4, kind: input, shape index: {}]   ;;  %s1076_s5 = inlined_call_operand.vmem [shape: f32[2,16,1], index: 5, kind: input, shape index: {}]   ;;  %s1077_s6 = inlined_call_operand.vmem [shape: f32[32,512], index: 6, kind: output, shape index: {}]  }
   0x1   :  { %s946_s23 = smov 0  }
   0x2 LB: > { %s775_s24 = sadd.s32 4294967295, %s902_s23   ;;  %s959_s25 = sadd.s32 1, %s902_s23   ;;  %s902_s23 = sphi %s946_s23, %s1082_s23   ;;  %s898_s22 = sphi %s944_s22, %s1081_s22   ;;  %s894_s21 = sphi %s942_s21, %s1080_s21  }
   0x3   : > { %s20_s26 = ssub.s32 %s902_s23, %s959_s25  ;;  %s23_s27 = sadd.s32 1, %s898_s22 }
   0x4   : > { %p21_p0 = scmp.eq.s32.totalorder %s20_s26, 0  ;;  %p30_p1 = scmp.ne.s32.totalorder %s898_s22, %s894_s21 }
   0x5   : > { %p31_p2 = scmp.eq.s32.totalorder %s902_s23, 0  ;;  %p170_p3 = scmp.eq.s32.totalorder %s775_s24, 3 }
   0x6   : > { %s970_s28 = scalar_select %p21_p0, %s898_s22, %s23_s27  }
   0x7   : > { %p972_p4 = por %p31_p2, %p30_p1  ;;  %p976_p5 = por %p170_p3, %p30_p1 }
   0x8   : > { %p778_p6 = scmp.ge.s32.totalorder %s902_s23, 4 }
   0xa   : > { %204 = sbr.rel (%p778_p6) target bundleno = 31 (0x1f), region = 32 }
  0x11   : > { %207 = sbr.rel (!%p972_p4) target bundleno = 24 (0x18), region = 36  ;;  %s209_s7 = sand.u32 (%p972_p4), 1, %s898_s22  }
  0x12   : > { %s780_s8 = sshll.u32 (%p972_p4), %s902_s23, 2  ;;  %s779_s9 = sshll.u32 (%p972_p4), %s209_s7, 3 }
  0x13   : > { %s213_s12 = scalar_lea.vmem (%p972_p4), %s1071_s0, %s780_s8  ;;  %s211_s13 = scalar_lea.vmem (%p972_p4), [#allocation2], %s779_s9 }
  0x14   : > { %v229_v0 = vld [vmem:[%s213_s12] sm:$0xf] (%p972_p4)  ;;  %v231_v1 = vld [vmem:[%s213_s12 + $0x10] sm:$0xf] (%p972_p4) }
  0x15   : > { %230 = vst [vmem:[%s211_s13] sm:$0xf] (%p972_p4), %v229_v0  ;;  %232 = vst [vmem:[%s211_s13 + $0x4] sm:$0xf] (%p972_p4), %v231_v1 }
  0x18 PF: > { %259 = sbr.rel (!%p972_p4) target bundleno = 31 (0x1f), region = 77  ;;  %s261_s14 = sand.u32 (%p972_p4), 1, %s898_s22  }
  0x19   : > { %s782_s15 = sshll.u32 (%p972_p4), %s902_s23, 2  ;;  %s781_s16 = sshll.u32 (%p972_p4), %s261_s14, 3 }
  0x1a   : > { %s265_s19 = scalar_lea.vmem (%p972_p4), %s1072_s1, %s782_s15  ;;  %s263_s20 = scalar_lea.vmem (%p972_p4), [#allocation3], %s781_s16 }
  0x1b   : > { %v281_v2 = vld [vmem:[%s265_s19] sm:$0xf] (%p972_p4)  ;;  %v283_v3 = vld [vmem:[%s265_s19 + $0x10] sm:$0xf] (%p972_p4) }
  0x1c   : > { %282 = vst [vmem:[%s263_s20] sm:$0xf] (%p972_p4), %v281_v2  ;;  %284 = vst [vmem:[%s263_s20 + $0x4] sm:$0xf] (%p972_p4), %v283_v3 }
  0x1f PF: > { %p783_p7 = scmp.ge.s32.totalorder %s902_s23, 1  ;;  %p310_p8 = scmp.lt.s32.totalorder %s902_s23, 5 }
  0x21   : > { %p311_p9 = pnand %p783_p7, %p310_p8 }
  0x22   : > { %s317_s26 = sand.u32 (!%p311_p9), 1, %s894_s21   ;;  %v904_v4 = vmov (!%p311_p9), 0.0   ;;  %vm905_vm0 = vmmov (!%p311_p9), 0   ;;  %v906_v8 = vmov (!%p311_p9), 0   ;;  %v363_v13 = vld [vmem:[%s1074_s3] sm:$0xff] (!%p311_p9)  ;;  %v792_v14 = vld [vmem:[%s1074_s3 + $0x10] sm:$0xff] (!%p311_p9) }
  0x23   : > { %314 = sbr.rel (%p311_p9) target bundleno = 720 (0x2d0), region = 118  ;;  %819 = vmatprep.subr.bf16.mxu0 (!%p311_p9), %v904_v4  ;;  %825 = vmatprep.subr.bf16.mxu1 (!%p311_p9), %v904_v4  ;;  %s784_s27 = sshll.u32 (!%p311_p9), %s317_s26, 3  ;;  %v876_v17 = vld [vmem:[%s1073_s2] sm:$0xff] (!%p311_p9)   ;;  %v364_v18 = vld [vmem:[%s1074_s3 + $0x8] sm:$0xff] (!%p311_p9)  ;;  %v793_v19 = vld [vmem:[%s1074_s3 + $0x18] sm:$0xff] (!%p311_p9)  ;;  %vm386_vm1 = vcmask (!%p311_p9), 130048  }
  0x24   : > { %821 = vmatprep.mubr.msk.bf16.mxu0 (!%p311_p9), %vm905_vm0, %v904_v4  ;;  %827 = vmatprep.mubr.msk.bf16.mxu1 (!%p311_p9), %vm905_vm0, %v904_v4  ;;  %s319_s29 = scalar_lea.vmem (!%p311_p9), [#allocation2], %s784_s27  ;;  %s326_s7 = scalar_lea.vmem (!%p311_p9), [#allocation3], %s784_s27  ;;  %v877_v21 = vld [vmem:[%s1073_s2 + $0x8] sm:$0xff] (!%p311_p9)   ;;  %v514_v22 = vld [vmem:[%s1076_s5] sm:$0xff] (!%p311_p9)  ;;  %v801_v24 = vld [vmem:[%s1076_s5 + $0x10] sm:$0xff] (!%p311_p9)  ;;  %vm531_vm2 = vcmask (!%p311_p9), 261120  }
  0x25   : > { %v357_v5 = vld [vmem:[%s319_s29] sm:$0xf] (!%p311_p9)  ;;  %v358_v6 = vld [vmem:[%s319_s29 + $0x4] sm:$0xf] (!%p311_p9)  ;;  %v431_v7 = vld [vmem:[%s326_s7] sm:$0xf] (!%p311_p9)  ;;  %874 = vset.pattern.permute.xlu0 (!%p311_p9), %v906_v8  ;;  %875 = vset.pattern.permute.xlu1 (!%p311_p9), %v906_v8 }
  0x26   : > { %v359_v9 = vmax.bf16 (!%p311_p9), %v906_v8, %v357_v5  ;;  %v360_v10 = vmax.bf16 (!%p311_p9), %v906_v8, %v358_v6  ;;  %v432_v11 = vld [vmem:[%s326_s7 + $0x4] sm:$0xf] (!%p311_p9)  ;;  %v433_v12 = vmax.bf16 (!%p311_p9), %v906_v8, %v431_v7  ;;  %367 = vperm.xlu0 (!%p311_p9), %874, %v363_v13   ;;  %443 = vperm.xlu1 (!%p311_p9), %875, %v792_v14   ;;  %v515_v23 = vld [vmem:[%s1076_s5 + $0x8] sm:$0xff] (!%p311_p9)  ;;  %v878_v48 = vld [vmem:[%s1075_s4] sm:$0xff] (!%p311_p9)   ;;  %s786_s14 = sshll.u32 (!%p311_p9), %s317_s26, 5 }
  0x27   : > { %v434_v15 = vmax.bf16 (!%p311_p9), %v906_v8, %v432_v11  ;;  %v802_v25 = vld [vmem:[%s1076_s5 + $0x18] sm:$0xff] (!%p311_p9)  ;;  %s355_s15 = scalar_lea.vmem (!%p311_p9), [#allocation4], %s786_s14  ;;  %v879_v60 = vld [vmem:[%s1075_s4 + $0x8] sm:$0xff] (!%p311_p9)  }
  0x28   : > { %v788_v16 = vcombine.low (!%p311_p9), %v359_v9, %v360_v10 }
  0x29   : > { %v795_v20 = vcombine.low (!%p311_p9), %v433_v12, %v434_v15 }
  0x2a   : > { %820 = vmatpush3.bf16.msra.mxu0 %v788_v16  ;;  %372 = vperm.xlu0 %874, %v364_v18   ;;  %s806_s21 = sshll.u32 (%p976_p5), %s775_s24, 3 }
  0x2b   : > { %826 = vmatpush3.bf16.msra.mxu1 %v795_v20  ;;  %448 = vperm.xlu1 %875, %v793_v19   ;;  %s656_s19 = scalar_lea.vmem (%p976_p5), %s1077_s6, %s806_s21 }
  0x2c   : > { %831 = vmatprep.subr.bf16.mxu0 %v904_v4  ;;  %839 = vmatprep.subr.bf16.mxu1 %v904_v4 }
  0x2d   : > { %822 = vmatmul.mubr.msk.bf16.vlgmr.msra.gmra.mrb[0].mxu0 %vm386_vm1, %v876_v17 }
  0x2e   : > { %828 = vmatmul.mubr.msk.bf16.vlgmr.msra.gmra.mrb[0].mxu1 %vm386_vm1, %v877_v21  ;;  %835 = vmatprep.mubr.msk.bf16.mxu0 %vm905_vm0, %v904_v4 }
  0x2f   : > { %518 = vperm.xlu0 %874, %v514_v22   ;;  %843 = vmatprep.mubr.msk.bf16.mxu1 %vm905_vm0, %v904_v4 }
  0x30   : > { %523 = vperm.xlu1 %875, %v515_v23  }
  0x33   : > { %587 = vperm.xlu0 %874, %v801_v24  }
  0x34   : > { %592 = vperm.xlu1 %875, %v802_v25  }
  0xa5   : > { %v368_v26 = vpop.permute.xlu0 %367  ;;  %v444_v27 = vpop.permute.xlu1 %443 }
  0xa9   : > { %v373_v28 = vpop.permute.xlu0 %372 }
  0xaa   : > { %v449_v29 = vpop.permute.xlu1 %448 }
  0xae   : > { %v519_v49 = vpop.permute.xlu0 %518 }
  0xaf   : > { %v524_v53 = vpop.permute.xlu1 %523 }
  0xb2   : > { %v588_v61 = vpop.permute.xlu0 %587 }
  0xb3   : > { %v593_v1 = vpop.permute.xlu1 %592 }
 0x100   : > { %v424_v30 = vpop.f32.mrb[0].mxu0 }
 0x101   : > { %v425_v31 = vadd.f32 %v424_v30, %v368_v26  ;;  %v499_v32 = vpop.f32.mrb[0].mxu1  ;;  %v823_v33 = vpop.f32.mrb[1].mxu0 }
 0x102   : > { %v500_v34 = vadd.f32 %v499_v32, %v444_v27  ;;  %v829_v35 = vpop.f32.mrb[1].mxu1  ;;  %v427_v36 = vpop.f32.mrb[2].mxu0 }
 0x103   : > { %v428_v37 = vadd.f32 %v427_v36, %v373_v28  ;;  %v502_v38 = vpop.f32.mrb[2].mxu1  ;;  %v824_v39 = vpop.f32.mrb[3].mxu0  ;;  %v506_v43 = vmax.f32 %v425_v31, 0.0 }
 0x104   : > { %v509_v40 = vmax.f32 %v500_v34, 0.0  ;;  %v503_v41 = vadd.f32 %v502_v38, %v449_v29  ;;  %v830_v42 = vpop.f32.mrb[3].mxu1 }
 0x105   : > { %v507_v44 = vmax.f32 %v428_v37, 0.0 }
 0x106   : > { %v510_v45 = vmax.f32 %v503_v41, 0.0 }
 0x107   : > { %v508_v46 = vpack.c.bf16 %v507_v44, %v506_v43 }
 0x108   : > { %v511_v47 = vpack.c.bf16 %v510_v45, %v509_v40 }
 0x109   : > { %832 = vmatpush3.bf16.msra.mxu0 %v508_v46  ;;  %840 = vmatpush3.bf16.msra.mxu1 %v508_v46 }
 0x10a   : > { %833 = vmatprep.subr.bf16.mxu0 %v904_v4  ;;  %841 = vmatprep.subr.bf16.mxu1 %v904_v4 }
 0x10d   : > { %834 = vmatpush3.bf16.msra.mxu0 %v511_v47 }
 0x110   : > { %836 = vmatmul.mubr.msk.bf16.vlgmr.msra.gmra.mrb[4].mxu0 %vm531_vm2, %v878_v48 }
 0x1e3   : > { %v569_v50 = vpop.f32.mrb[4].mxu0 }
 0x1e4   : > { %v570_v51 = vadd.f32 %v569_v50, %v519_v49  ;;  %v837_v52 = vpop.f32.mrb[5].mxu0 }
 0x1e5   : > { %v572_v54 = vpop.f32.mrb[6].mxu0 }
 0x1e6   : > { %644 = vst [vmem:[%s355_s15] sm:$0xff] %v570_v51  ;;  %v573_v55 = vadd.f32 %v572_v54, %v524_v53  ;;  %v838_v56 = vpop.f32.mrb[7].mxu0  ;;  %v576_v57 = vmax.f32 %v570_v51, 0.0 }
 0x1e8   : > { %v577_v58 = vmax.f32 %v573_v55, 0.0  ;;  %645 = vst [vmem:[%s355_s15 + $0x8] sm:$0xff] %v573_v55 }
 0x1ea   : > { %v578_v59 = vpack.c.bf16 %v577_v58, %v576_v57 }
 0x1ec   : > { %842 = vmatpush3.bf16.msra.mxu1 %v578_v59 }
 0x1ed   : > { %v690_v5 = vld [vmem:[%s355_s15] sm:$0xff] (%p976_p5) }
 0x1ee   : > { %691 = vst [vmem:[%s656_s19] sm:$0xff] (%p976_p5), %v690_v5 }
 0x1ef   : > { %844 = vmatmul.mubr.msk.bf16.vlgmr.msra.gmra.mrb[4].mxu1 %vm531_vm2, %v879_v60  ;;  %v692_v6 = vld [vmem:[%s355_s15 + $0x8] sm:$0xff] (%p976_p5) }
 0x1f0   : > { %693 = vst [vmem:[%s656_s19 + $0x20] sm:$0xff] (%p976_p5), %v692_v6 }
 0x2c1   : > { %654 = sbr.rel (!%p976_p5) target bundleno = 720 (0x2d0), region = 130 }
 0x2c2   : > { %v637_v62 = vpop.f32.mrb[4].mxu1 }
 0x2c3   : > { %v638_v63 = vadd.f32 %v637_v62, %v588_v61  ;;  %v845_v0 = vpop.f32.mrb[5].mxu1 }
 0x2c4   : > { %v640_v2 = vpop.f32.mrb[6].mxu1 }
 0x2c5   : > { %646 = vst [vmem:[%s355_s15 + $0x10] sm:$0xff] %v638_v63  ;;  %v641_v3 = vadd.f32 %v640_v2, %v593_v1  ;;  %v846_v4 = vpop.f32.mrb[7].mxu1 }
 0x2c7   : > { %647 = vst [vmem:[%s355_s15 + $0x18] sm:$0xff] %v641_v3 }
 0x2cc   : > { %v694_v7 = vld [vmem:[%s355_s15 + $0x10] sm:$0xff] }
 0x2cd   : > { %695 = vst [vmem:[%s656_s19 + $0x40] sm:$0xff] %v694_v7 }
 0x2ce   : > { %v696_v8 = vld [vmem:[%s355_s15 + $0x18] sm:$0xff] }
 0x2cf   : > { %697 = vst [vmem:[%s656_s19 + $0x60] sm:$0xff] %v696_v8 }
 0x2d0 PF: > { %p13_p10 = scmp.ge.s32.totalorder %s959_s25, 6   ;;  %s1080_s21 = smov %s898_s22 }
 0x2d1   : > { %s1081_s22 = smov %s970_s28  ;;  %s1082_s23 = smov %s959_s25 }
 0x2d2   :  { %15 = sbr.rel (!%p13_p10) target bundleno = 2 (0x2), region = 211 }

</bundles_post_ra>
